<compile_context>
chip_gen: v7x
topology: tpu7x:2x2x1
jax: 0.10.0
libtpu: 0.0.40
codegen_flags: <defaults>
</compile_context>

<pallas_src>
import jax
import jax.numpy as jnp
from jax.experimental import pallas as pl
from jax.experimental.pallas import tpu as pltpu

LANE = 128
SUBLANE = 8

H1, H2, H3 = 128, 64, 32          # hidden widths of the MLP

MAX_TILE_B = 8192                 # upper bound on rows per grid step
TARGET_TILES = 6                  # >= 3 pipeline steps per TensorCore on dual-TC chips
VMEM_TILE_BUDGET = 20 * 1024 * 1024   # bytes of VMEM we allow the batch tiles to use
VMEM_LIMIT_BYTES = 32 * 1024 * 1024   # scoped VMEM limit (safe on v5e/v6e/v7x)


def _round_up(n, m):
    return ((n + m - 1) // m) * m


def _vmem_bytes_per_row(in_f, num_classes):
    """Estimated VMEM bytes per batch row (lane-padded f32, double-buffered I/O)."""
    lane = lambda n: _round_up(max(n, 1), LANE)
    x_bytes = lane(in_f) * 4 * 2            # input tile, double-buffered
    out_bytes = lane(num_classes) * 4 * 2   # output tile, double-buffered
    act_bytes = (lane(H1) + lane(H2) + lane(H3)) * 4   # f32 intermediates
    return x_bytes + out_bytes + act_bytes


def _choose_tile_b(B, in_f, num_classes):
    """Pick the batch tile: as big as the VMEM budget allows, but >= TARGET_TILES
    grid steps for medium/large batches (keeps both v7x TensorCores busy)."""
    bpr = _vmem_bytes_per_row(in_f, num_classes)
    max_tb = (VMEM_TILE_BUDGET // bpr) // SUBLANE * SUBLANE
    max_tb = max(SUBLANE, min(MAX_TILE_B, max_tb))
    if B <= 2 * SUBLANE:
        return B                            # one block == full batch dim (always legal)
    tb = _round_up(-(-B // TARGET_TILES), SUBLANE)
    return int(min(tb, max_tb))


def gesture_mlp_kernel(x_ref,
                       w1_ref, b1_ref,
                       w2_ref, b2_ref,
                       w3_ref, b3_ref,
                       w4_ref, b4_ref,
                       o_ref):
    """Fused forward: 3x (matmul -> bias -> ReLU) + final matmul + bias, all f32."""
    x = x_ref[...]                                                        # f32 [TB, IN]

    h = jnp.dot(x, w1_ref[...], preferred_element_type=jnp.float32) + b1_ref[...]
    h = jnp.maximum(h, 0.0)

    h = jnp.dot(h, w2_ref[...], preferred_element_type=jnp.float32) + b2_ref[...]
    h = jnp.maximum(h, 0.0)

    h = jnp.dot(h, w3_ref[...], preferred_element_type=jnp.float32) + b3_ref[...]
    h = jnp.maximum(h, 0.0)

    h = jnp.dot(h, w4_ref[...], preferred_element_type=jnp.float32) + b4_ref[...]
    o_ref[...] = h.astype(o_ref.dtype)                                    # f32 [TB, NC]


@jax.jit
def gesture_model_forward(x, params):
    """x: [B, input_size] float32. params: dict w1..w4 ([in,out]) / b1..b4 ([1,out])."""
    B, in_f = x.shape
    num_classes = params["w4"].shape[1]

    tb = _choose_tile_b(B, in_f, num_classes)
    n_tiles = pl.cdiv(B, tb)

    # Weights / biases: constant block index -> DMA'd once, VMEM-resident.
    def resident(shape):
        return pl.BlockSpec(shape, lambda i: (0, 0))

    in_specs = [
        pl.BlockSpec((tb, in_f), lambda i: (i, 0)),        # x: tiled over batch
        resident((in_f, H1)), resident((1, H1)),           # w1, b1
        resident((H1, H2)), resident((1, H2)),             # w2, b2
        resident((H2, H3)), resident((1, H3)),             # w3, b3
        resident((H3, num_classes)), resident((1, num_classes)),  # w4, b4
    ]
    out_spec = pl.BlockSpec((tb, num_classes), lambda i: (i, 0))

    flops = 2 * B * (in_f * H1 + H1 * H2 + H2 * H3 + H3 * num_classes)
    param_bytes = sum(int(p.size) for p in params.values()) * 4
    bytes_accessed = B * in_f * 4 + B * num_classes * 4 + param_bytes
    cost = pl.CostEstimate(flops=flops, transcendentals=0,
                           bytes_accessed=bytes_accessed)

    out = pl.pallas_call(
        gesture_mlp_kernel,
        out_shape=jax.ShapeDtypeStruct((B, num_classes), jnp.float32),
        grid_spec=pltpu.PrefetchScalarGridSpec(
            num_scalar_prefetch=0,
            grid=(n_tiles,),
            in_specs=in_specs,
            out_specs=out_spec,
        ),
        compiler_params=pltpu.CompilerParams(
            dimension_semantics=("parallel",),
            vmem_limit_bytes=VMEM_LIMIT_BYTES,
        ),
        cost_estimate=cost,
    )(x,
      params["w1"], params["b1"],
      params["w2"], params["b2"],
      params["w3"], params["b3"],
      params["w4"], params["b4"])

    return out


def init_params(key, input_size, num_classes):
    """Deterministic init mimicking PyTorch nn.Linear default (U[-1/sqrt(fan_in), +])."""
    dims = [(input_size, H1), (H1, H2), (H2, H3), (H3, num_classes)]
    params = {}
    for i, (fan_in, fan_out) in enumerate(dims, start=1):
        key, kw, kb = jax.random.split(key, 3)
        bound = 1.0 / jnp.sqrt(jnp.float32(fan_in))
        params[f"w{i}"] = jax.random.uniform(
            kw, (fan_in, fan_out), jnp.float32, minval=-bound, maxval=bound)
        params[f"b{i}"] = jax.random.uniform(
            kb, (1, fan_out), jnp.float32, minval=-bound, maxval=bound)
    return params


def reference_forward(x, params):
    """Pure-JAX reference with identical layer structure (PyTorch semantics)."""
    h = jnp.maximum(x @ params["w1"] + params["b1"], 0.0)
    h = jnp.maximum(h @ params["w2"] + params["b2"], 0.0)
    h = jnp.maximum(h @ params["w3"] + params["b3"], 0.0)
    return h @ params["w4"] + params["b4"]


if __name__ == "__main__":
    key = jax.random.PRNGKey(0)
    input_size = 64      # synthetic: X_train.shape[1]
    num_classes = 10     # synthetic: len(label_encoder.classes_)

    key, kx, kx2, kp = jax.random.split(key, 4)
    params = init_params(kp, input_size, num_classes)

    # Primary small-shape check (batch = 8, single tile).
    x = jax.random.normal(kx, (8, input_size), jnp.float32)
    out = jax.block_until_ready(gesture_model_forward(x, params))
    assert out.shape == (8, num_classes)
    ref = reference_forward(x, params)
    assert jnp.allclose(out, ref, atol=5e-2, rtol=5e-2), "Pallas vs reference mismatch (B=8)"

    # Ragged-batch check (B not a multiple of the tile): exercises the masked final block.
    x2 = jax.random.normal(kx2, (50, input_size), jnp.float32)
    out2 = jax.block_until_ready(gesture_model_forward(x2, params))
    assert out2.shape == (50, num_classes)
    ref2 = reference_forward(x2, params)
    assert jnp.allclose(out2, ref2, atol=5e-2, rtol=5e-2), "Pallas vs reference mismatch (B=50)"

    print("KERNEL_OK")
</pallas_src>

<mosaic_0001>
module attributes {stable_mosaic.version = 11 : i64} {
  func.func @gesture_mlp_kernel(%arg0: i32, %arg1: memref<8x64xf32, #tpu.memory_space<vmem>>, %arg2: memref<64x128xf32, #tpu.memory_space<vmem>>, %arg3: memref<1x128xf32, #tpu.memory_space<vmem>>, %arg4: memref<128x64xf32, #tpu.memory_space<vmem>>, %arg5: memref<1x64xf32, #tpu.memory_space<vmem>>, %arg6: memref<64x32xf32, #tpu.memory_space<vmem>>, %arg7: memref<1x32xf32, #tpu.memory_space<vmem>>, %arg8: memref<32x10xf32, #tpu.memory_space<vmem>>, %arg9: memref<1x10xf32, #tpu.memory_space<vmem>>, %arg10: memref<8x10xf32, #tpu.memory_space<vmem>>) attributes {dimension_semantics = [#tpu.dimension_semantics<parallel>], iteration_bounds = array<i64: 1>, scalar_prefetch = 0 : i64, scratch_operands = 0 : i64, tpu.core_type = #tpu.core_type<tc>, window_params = [{transform_indices = @transform_0, window_bounds = array<i64: 8, 64>}, {pipeline_mode = #tpu.pipeline_mode<synchronous>, transform_indices = @transform_1, window_bounds = array<i64: 64, 128>}, {pipeline_mode = #tpu.pipeline_mode<synchronous>, transform_indices = @transform_2, window_bounds = array<i64: 1, 128>}, {pipeline_mode = #tpu.pipeline_mode<synchronous>, transform_indices = @transform_3, window_bounds = array<i64: 128, 64>}, {pipeline_mode = #tpu.pipeline_mode<synchronous>, transform_indices = @transform_4, window_bounds = array<i64: 1, 64>}, {pipeline_mode = #tpu.pipeline_mode<synchronous>, transform_indices = @transform_5, window_bounds = array<i64: 64, 32>}, {pipeline_mode = #tpu.pipeline_mode<synchronous>, transform_indices = @transform_6, window_bounds = array<i64: 1, 32>}, {pipeline_mode = #tpu.pipeline_mode<synchronous>, transform_indices = @transform_7, window_bounds = array<i64: 32, 10>}, {pipeline_mode = #tpu.pipeline_mode<synchronous>, transform_indices = @transform_8, window_bounds = array<i64: 1, 10>}, {transform_indices = @transform_9, window_bounds = array<i64: 8, 10>}]} {
    %c0 = arith.constant 0 : index
    %c0_0 = arith.constant 0 : index
    %0 = vector.load %arg1[%c0, %c0_0] : memref<8x64xf32, #tpu.memory_space<vmem>>, vector<8x64xf32>
    %c0_1 = arith.constant 0 : index
    %c0_2 = arith.constant 0 : index
    %1 = vector.load %arg2[%c0_1, %c0_2] : memref<64x128xf32, #tpu.memory_space<vmem>>, vector<64x128xf32>
    %cst = arith.constant dense<0.000000e+00> : vector<8x128xf32>
    %2 = tpu.matmul %0, %1, %cst {dimension_numbers = #tpu.dot_dimension_numbers<[1], [0], [0], [1], [0, 0, 1, 1], [], []>} : vector<8x64xf32>, vector<64x128xf32>, vector<8x128xf32> -> vector<8x128xf32>
    %c0_3 = arith.constant 0 : index
    %c0_4 = arith.constant 0 : index
    %3 = vector.load %arg3[%c0_3, %c0_4] : memref<1x128xf32, #tpu.memory_space<vmem>>, vector<1x128xf32>
    %4 = vector.broadcast %3 : vector<1x128xf32> to vector<8x128xf32>
    %5 = arith.addf %2, %4 : vector<8x128xf32>
    %cst_5 = arith.constant 0.000000e+00 : f32
    %6 = vector.broadcast %cst_5 : f32 to vector<8x128xf32>
    %7 = arith.maximumf %5, %6 : vector<8x128xf32>
    %c0_6 = arith.constant 0 : index
    %c0_7 = arith.constant 0 : index
    %8 = vector.load %arg4[%c0_6, %c0_7] : memref<128x64xf32, #tpu.memory_space<vmem>>, vector<128x64xf32>
    %cst_8 = arith.constant dense<0.000000e+00> : vector<8x64xf32>
    %9 = tpu.matmul %7, %8, %cst_8 {dimension_numbers = #tpu.dot_dimension_numbers<[1], [0], [0], [1], [0, 0, 1, 1], [], []>} : vector<8x128xf32>, vector<128x64xf32>, vector<8x64xf32> -> vector<8x64xf32>
    %c0_9 = arith.constant 0 : index
    %c0_10 = arith.constant 0 : index
    %10 = vector.load %arg5[%c0_9, %c0_10] : memref<1x64xf32, #tpu.memory_space<vmem>>, vector<1x64xf32>
    %11 = vector.broadcast %10 : vector<1x64xf32> to vector<8x64xf32>
    %12 = arith.addf %9, %11 : vector<8x64xf32>
    %cst_11 = arith.constant 0.000000e+00 : f32
    %13 = vector.broadcast %cst_11 : f32 to vector<8x64xf32>
    %14 = arith.maximumf %12, %13 : vector<8x64xf32>
    %c0_12 = arith.constant 0 : index
    %c0_13 = arith.constant 0 : index
    %15 = vector.load %arg6[%c0_12, %c0_13] : memref<64x32xf32, #tpu.memory_space<vmem>>, vector<64x32xf32>
    %cst_14 = arith.constant dense<0.000000e+00> : vector<8x32xf32>
    %16 = tpu.matmul %14, %15, %cst_14 {dimension_numbers = #tpu.dot_dimension_numbers<[1], [0], [0], [1], [0, 0, 1, 1], [], []>} : vector<8x64xf32>, vector<64x32xf32>, vector<8x32xf32> -> vector<8x32xf32>
    %c0_15 = arith.constant 0 : index
    %c0_16 = arith.constant 0 : index
    %17 = vector.load %arg7[%c0_15, %c0_16] : memref<1x32xf32, #tpu.memory_space<vmem>>, vector<1x32xf32>
    %18 = vector.broadcast %17 : vector<1x32xf32> to vector<8x32xf32>
    %19 = arith.addf %16, %18 : vector<8x32xf32>
    %cst_17 = arith.constant 0.000000e+00 : f32
    %20 = vector.broadcast %cst_17 : f32 to vector<8x32xf32>
    %21 = arith.maximumf %19, %20 : vector<8x32xf32>
    %c0_18 = arith.constant 0 : index
    %c0_19 = arith.constant 0 : index
    %22 = vector.load %arg8[%c0_18, %c0_19] : memref<32x10xf32, #tpu.memory_space<vmem>>, vector<32x10xf32>
    %cst_20 = arith.constant dense<0.000000e+00> : vector<8x10xf32>
    %23 = tpu.matmul %21, %22, %cst_20 {dimension_numbers = #tpu.dot_dimension_numbers<[1], [0], [0], [1], [0, 0, 1, 1], [], []>} : vector<8x32xf32>, vector<32x10xf32>, vector<8x10xf32> -> vector<8x10xf32>
    %c0_21 = arith.constant 0 : index
    %c0_22 = arith.constant 0 : index
    %24 = vector.load %arg9[%c0_21, %c0_22] : memref<1x10xf32, #tpu.memory_space<vmem>>, vector<1x10xf32>
    %25 = vector.broadcast %24 : vector<1x10xf32> to vector<8x10xf32>
    %26 = arith.addf %23, %25 : vector<8x10xf32>
    %c0_23 = arith.constant 0 : index
    %c0_24 = arith.constant 0 : index
    %27 = vector.load %arg10[%c0_23, %c0_24] : memref<8x10xf32, #tpu.memory_space<vmem>>, vector<8x10xf32>
    tpu.vector_store %arg10[%c0_23, %c0_24], %26 {strides = array<i32>} : memref<8x10xf32, #tpu.memory_space<vmem>>, vector<8x10xf32>,
    return
  }
  func.func @transform_0(%arg0: i32) -> (i32, i32) {
    %c0_i32 = arith.constant 0 : i32
    %c0_i32_0 = arith.constant 0 : i32
    return %arg0, %c0_i32 : i32, i32
  }
  func.func @transform_1(%arg0: i32) -> (i32, i32) {
    %c0_i32 = arith.constant 0 : i32
    %c0_i32_0 = arith.constant 0 : i32
    %c0_i32_1 = arith.constant 0 : i32
    return %c0_i32, %c0_i32_0 : i32, i32
  }
  func.func @transform_2(%arg0: i32) -> (i32, i32) {
    %c0_i32 = arith.constant 0 : i32
    %c0_i32_0 = arith.constant 0 : i32
    %c0_i32_1 = arith.constant 0 : i32
    return %c0_i32, %c0_i32_0 : i32, i32
  }
  func.func @transform_3(%arg0: i32) -> (i32, i32) {
    %c0_i32 = arith.constant 0 : i32
    %c0_i32_0 = arith.constant 0 : i32
    %c0_i32_1 = arith.constant 0 : i32
    return %c0_i32, %c0_i32_0 : i32, i32
  }
  func.func @transform_4(%arg0: i32) -> (i32, i32) {
    %c0_i32 = arith.constant 0 : i32
    %c0_i32_0 = arith.constant 0 : i32
    %c0_i32_1 = arith.constant 0 : i32
    return %c0_i32, %c0_i32_0 : i32, i32
  }
  func.func @transform_5(%arg0: i32) -> (i32, i32) {
    %c0_i32 = arith.constant 0 : i32
    %c0_i32_0 = arith.constant 0 : i32
    %c0_i32_1 = arith.constant 0 : i32
    return %c0_i32, %c0_i32_0 : i32, i32
  }
  func.func @transform_6(%arg0: i32) -> (i32, i32) {
    %c0_i32 = arith.constant 0 : i32
    %c0_i32_0 = arith.constant 0 : i32
    %c0_i32_1 = arith.constant 0 : i32
    return %c0_i32, %c0_i32_0 : i32, i32
  }
  func.func @transform_7(%arg0: i32) -> (i32, i32) {
    %c0_i32 = arith.constant 0 : i32
    %c0_i32_0 = arith.constant 0 : i32
    %c0_i32_1 = arith.constant 0 : i32
    return %c0_i32, %c0_i32_0 : i32, i32
  }
  func.func @transform_8(%arg0: i32) -> (i32, i32) {
    %c0_i32 = arith.constant 0 : i32
    %c0_i32_0 = arith.constant 0 : i32
    %c0_i32_1 = arith.constant 0 : i32
    return %c0_i32, %c0_i32_0 : i32, i32
  }
  func.func @transform_9(%arg0: i32) -> (i32, i32) {
    %c0_i32 = arith.constant 0 : i32
    %c0_i32_0 = arith.constant 0 : i32
    return %arg0, %c0_i32 : i32, i32
  }
}

</mosaic_0001>

<bundles_post_ra>
// kernel: gesture_model_forward.1
= control target key start
LH: loop header
LB: loop body
LE: loop exit
PB: predicated region body
PF: predicated region fallthrough
CT: control target
= control target key end

     0   :  { %v621_v3 = vmov 0.0|0.0   ;;  %vm622_vm0 = vmmov 0   ;;  %v623_v6 = vmov 0.0   ;;  %s838_s0 = inlined_call_operand.vmem [shape: f32[8,64], index: 0, kind: input, shape index: {}]   ;;  %s839_s1 = inlined_call_operand.vmem [shape: f32[64,128], index: 1, kind: input, shape index: {}]   ;;  %s840_s2 = inlined_call_operand.vmem [shape: f32[1,128], index: 2, kind: input, shape index: {}]   ;;  %s841_s3 = inlined_call_operand.vmem [shape: f32[128,64], index: 3, kind: input, shape index: {}]   ;;  %s842_s4 = inlined_call_operand.vmem [shape: f32[1,64], index: 4, kind: input, shape index: {}]   ;;  %s843_s5 = inlined_call_operand.vmem [shape: f32[64,32], index: 5, kind: input, shape index: {}]   ;;  %s844_s6 = inlined_call_operand.vmem [shape: f32[1,32], index: 6, kind: input, shape index: {}]   ;;  %s845_s7 = inlined_call_operand.vmem [shape: f32[32,10], index: 7, kind: input, shape index: {}]   ;;  %s846_s8 = inlined_call_operand.vmem [shape: f32[1,10], index: 8, kind: input, shape index: {}]   ;;  %s847_s9 = inlined_call_operand.hbm [shape: f32[8,10], index: 9, kind: output, shape index: {}]  }
   0x1   :  { %v34_v0 = vld [vmem:[%s839_s1] sm:$0xff]  ;;  %v35_v1 = vld [vmem:[%s839_s1 + $0x8] sm:$0xff]  ;;  %v36_v2 = vld [vmem:[%s839_s1 + $0x10] sm:$0xff]  ;;  %539 = vmatprep.subr.bf16.mxu0 %v621_v3  ;;  %471 = vmatprep.mubr.msk.f32.mxu0 %vm622_vm0, %v623_v6 }
   0x2   :  { %v540_v4 = vpack.c.bf16 %v35_v1, %v34_v0  ;;  %v37_v5 = vld [vmem:[%s839_s1 + $0x18] sm:$0xff]  ;;  %551 = vmatprep.subr.bf16.mxu1 %v621_v3  ;;  %506 = vmatprep.mubr.msk.f32.mxu1 %vm622_vm0, %v623_v6  ;;  %v124_v8 = vld [vmem:[%s841_s3] sm:$0xff]  ;;  %v125_v9 = vld [vmem:[%s841_s3 + $0x8] sm:$0xff] }
   0x3   :  { %v543_v7 = vpack.c.bf16 %v37_v5, %v36_v2  ;;  %v126_v10 = vld [vmem:[%s841_s3 + $0x10] sm:$0xff]  ;;  %v38_v11 = vld [vmem:[%s839_s1 + $0x20] sm:$0xff]  ;;  %v39_v12 = vld [vmem:[%s839_s1 + $0x28] sm:$0xff]  ;;  %v552_v13 = vpack.c.bf16 %v125_v9, %v124_v8 }
   0x4   :  { %541 = vmatpush3.bf16.msra.mxu0 %v540_v4  ;;  %v127_v14 = vld [vmem:[%s841_s3 + $0x18] sm:$0xff]  ;;  %v546_v16 = vpack.c.bf16 %v39_v12, %v38_v11  ;;  %v128_v17 = vld [vmem:[%s841_s3 + $0x20] sm:$0xff]  ;;  %v129_v18 = vld [vmem:[%s841_s3 + $0x28] sm:$0xff] }
   0x5   :  { %542 = vmatprep.subr.bf16.mxu0 %v621_v3  ;;  %553 = vmatpush3.bf16.msra.mxu1 %v552_v13  ;;  %v555_v15 = vpack.c.bf16 %v127_v14, %v126_v10  ;;  %v40_v19 = vld [vmem:[%s839_s1 + $0x30] sm:$0xff]  ;;  %v41_v20 = vld [vmem:[%s839_s1 + $0x38] sm:$0xff] }
   0x6   :  { %554 = vmatprep.subr.bf16.mxu1 %v621_v3 }
   0x8   :  { %544 = vmatpush3.bf16.msra.mxu0 %v543_v7 }
   0x9   :  { %545 = vmatprep.subr.bf16.mxu0 %v621_v3 }
   0xa   :  { %14 = vsyncpa [#allocation3], 0  ;;  %556 = vmatpush3.bf16.msra.mxu1 %v555_v15  ;;  %v558_v21 = vpack.c.bf16 %v129_v18, %v128_v17  ;;  %v549_v22 = vpack.c.bf16 %v41_v20, %v40_v19  ;;  %v130_v23 = vld [vmem:[%s841_s3 + $0x30] sm:$0xff]  ;;  %v131_v24 = vld [vmem:[%s841_s3 + $0x38] sm:$0xff]  ;;  %vm49_vm1 = vcmask 523264   ;;  %vm318_vm2 = vcmask 261120  }
   0xb   :  { %557 = vmatprep.subr.bf16.mxu1 %v621_v3  ;;  %v561_v25 = vpack.c.bf16 %v131_v24, %v130_v23  ;;  %v33_v26 = vld [vmem:[%s838_s0] sm:$0xff]  ;;  %v133_v28 = vld [vmem:[%s841_s3 + $0x48] sm:$0xff]  ;;  %v134_v30 = vld [vmem:[%s841_s3 + $0x50] sm:$0xff]  ;;  %s624_s1 = smov [#allocation2]   ;;  %vm392_vm3 = vcmask 80896  }
   0xc   :  { %547 = vmatpush3.bf16.msra.mxu0 %v546_v16  ;;  %v132_v27 = vld [vmem:[%s841_s3 + $0x40] sm:$0xff]  ;;  %v135_v31 = vld [vmem:[%s841_s3 + $0x58] sm:$0xff]  ;;  %v137_v34 = vld [vmem:[%s841_s3 + $0x68] sm:$0xff]  ;;  %s400_s20 = sshll.u32 %s624_s1, 4  ;;  %s401_s20 = int_to_ptr.vmem [resolvable:$true] %s400_s20 }
   0xd   :  { %548 = vmatprep.subr.bf16.mxu0 %v621_v3  ;;  %v564_v29 = vpack.c.bf16 %v133_v28, %v132_v27  ;;  %v567_v32 = vpack.c.bf16 %v135_v31, %v134_v30  ;;  %v136_v33 = vld [vmem:[%s841_s3 + $0x60] sm:$0xff]  ;;  %v138_v36 = vld [vmem:[%s841_s3 + $0x70] sm:$0xff]  ;;  %v139_v37 = vld [vmem:[%s841_s3 + $0x78] sm:$0xff]  ;;  %p602_p1 = scmp.lt.s32.totalorder %s401_s20, %s401_s20 }
   0xe   :  { %559 = vmatpush3.bf16.msra.mxu1 %v558_v21  ;;  %v570_v35 = vpack.c.bf16 %v137_v34, %v136_v33  ;;  %v573_v38 = vpack.c.bf16 %v139_v37, %v138_v36  ;;  %v218_v39 = vld [vmem:[%s843_s5] sm:$0xff]  ;;  %v219_v40 = vld [vmem:[%s843_s5 + $0x8] sm:$0xff]  ;;  %v220_v41 = vld [vmem:[%s843_s5 + $0x10] sm:$0xff] }
   0xf   :  { %560 = vmatprep.subr.bf16.mxu1 %v621_v3  ;;  %v576_v42 = vpack.c.bf16 %v219_v40, %v218_v39  ;;  %v221_v43 = vld [vmem:[%s843_s5 + $0x18] sm:$0xff]  ;;  %v222_v45 = vld [vmem:[%s843_s5 + $0x20] sm:$0xff]  ;;  %v223_v46 = vld [vmem:[%s843_s5 + $0x28] sm:$0xff] }
  0x10   :  { %550 = vmatpush3.bf16.msra.mxu0 %v549_v22  ;;  %v579_v44 = vpack.c.bf16 %v221_v43, %v220_v41  ;;  %v582_v47 = vpack.c.bf16 %v223_v46, %v222_v45  ;;  %v408_v48 = vld [vmem:[%s840_s2] ss:$0 sm:$0xff]  ;;  %v224_v53 = vld [vmem:[%s843_s5 + $0x30] sm:$0xff]  ;;  %v225_v54 = vld [vmem:[%s843_s5 + $0x38] sm:$0xff] }
  0x11   :  { %575 = vmatprep.subr.bf16.mxu0 %v621_v3  ;;  %v585_v55 = vpack.c.bf16 %v225_v54, %v224_v53  ;;  %v410_v56 = vld [vmem:[%s842_s4] ss:$0 sm:$0xff]  ;;  %v308_v58 = vld [vmem:[%s845_s7 + $0x8] sm:$0xff]  ;;  %v309_v0 = vld [vmem:[%s845_s7 + $0x10] sm:$0xff] }
  0x12   :  { %562 = vmatpush3.bf16.msra.mxu1 %v561_v25  ;;  %v307_v57 = vld [vmem:[%s845_s7] sm:$0xff]  ;;  %v310_v1 = vld [vmem:[%s845_s7 + $0x18] sm:$0xff]  ;;  %s597_s7 = scalar_lea.vmem %s401_s20, 128 }
  0x13   :  { %472 = vmatmul.mubr.msk.f32.vlgmr.msra.gmra.mrb[0].mxu0 %vm49_vm1, %v33_v26  ;;  %563 = vmatprep.subr.bf16.mxu1 %v621_v3  ;;  %v588_v62 = vpack.c.bf16 %v308_v58, %v307_v57  ;;  %v591_v2 = vpack.c.bf16 %v310_v1, %v309_v0  ;;  %v411_v4 = vld [vmem:[%s844_s6] ss:$0 sm:$0xff]  ;;  %p598_p0 = scmp.ne.s32.totalorder %s401_s20, %s597_s7  ;;  %p603_p2 = scmp.lt.s32.totalorder %s597_s7, %s597_s7 }
  0x14   :  { %525 = vmatprep.mubr.msk.f32.mxu0 %vm622_vm0, %v623_v6  ;;  %577 = vmatpush3.bf16.msra.mxu0 %v576_v42 }
  0x15   :  { %578 = vmatprep.subr.bf16.mxu0 %v621_v3  ;;  %p604_p3 = por %p603_p2, %p602_p1 }
  0x16   :  { %565 = vmatpush3.bf16.msra.mxu1 %v564_v29 }
  0x17   :  { %566 = vmatprep.subr.bf16.mxu1 %v621_v3  ;;  %p605_p4 = pnand %p604_p3, %p598_p0 }
  0x18   :  { %580 = vmatpush3.bf16.msra.mxu0 %v579_v44 }
  0x19   :  { %581 = vmatprep.subr.bf16.mxu0 %v621_v3 }
  0x1a   :  { %568 = vmatpush3.bf16.msra.mxu1 %v567_v32 }
  0x1b   :  { %569 = vmatprep.subr.bf16.mxu1 %v621_v3 }
  0x1c   :  { %583 = vmatpush3.bf16.msra.mxu0 %v582_v47 }
  0x1d   :  { %584 = vmatprep.subr.bf16.mxu0 %v621_v3 }
  0x1e   :  { %571 = vmatpush3.bf16.msra.mxu1 %v570_v35 }
  0x1f   :  { %572 = vmatprep.subr.bf16.mxu1 %v621_v3 }
  0x20   :  { %586 = vmatpush3.bf16.msra.mxu0 %v585_v55 }
  0x21   :  { %587 = vmatprep.subr.bf16.mxu0 %v621_v3 }
  0x22   :  { %574 = vmatpush3.bf16.msra.mxu1 %v573_v38 }
  0xe6   :  { %v119_v49 = vpop.f32.mrb[0].mxu0 }
  0xe7   :  { %v120_v50 = vadd.f32 %v408_v48, %v119_v49  ;;  %v473_v51 = vpop.f32.mrb[1].mxu0 }
  0xe9   :  { %v123_v52 = vmax.f32 %v120_v50, 0.0 }
  0xeb   :  { %507 = vmatmul.mubr.f32.vlgmr.msra.gmra.mrb[0].mxu1 %v123_v52 }
 0x1be   :  { %v213_v59 = vpop.f32.mrb[0].mxu1 }
 0x1bf   :  { %v214_v60 = vadd.f32 %v410_v56, %v213_v59  ;;  %v508_v61 = vpop.f32.mrb[1].mxu1 }
 0x1c1   :  { %v217_v63 = vmax.f32 %v214_v60, 0.0 }
 0x1c3   :  { %526 = vmatmul.mubr.msk.f32.vlgmr.msra.gmra.mrb[2].mxu0 %vm49_vm1, %v217_v63 }
 0x1c4   :  { %589 = vmatpush3.bf16.msra.mxu0 %v588_v62  ;;  %536 = vmatprep.mubr.msk.f32.mxu0 %vm622_vm0, %v623_v6 }
 0x1c5   :  { %590 = vmatprep.subr.bf16.mxu0 %v621_v3  ;;  %v413_v3 = vld [vmem:[%s846_s8] ss:$0 sm:$0xff] }
 0x1c8   :  { %592 = vmatpush3.bf16.msra.mxu0 %v591_v2 }
 0x296   :  { %v302_v5 = vpop.f32.mrb[2].mxu0 }
 0x297   :  { %v303_v7 = vadd.f32 %v411_v4, %v302_v5  ;;  %v527_v8 = vpop.f32.mrb[3].mxu0 }
 0x299   :  { %v306_v6 = vmax.f32 %v303_v7, 0.0 }
 0x29b   :  { %537 = vmatmul.mubr.msk.f32.vlgmr.msra.gmra.mrb[4].mxu0 %vm318_vm2, %v306_v6 }
 0x36e   :  { %v388_v9 = vpop.f32.mrb[4].mxu0 }
 0x36f   :  { %v389_v10 = vadd.f32 %v413_v3, %v388_v9  ;;  %v538_v11 = vpop.f32.mrb[5].mxu0 }
 0x371   :  { %393 = vst.msk [vmem:[#allocation2] sm:$0xff] %vm392_vm3, %v389_v10 }
 0x372   :  { %608 = shalt.err (!%p605_p4)
}
 0x373   :  { %s609_s3 = scalar_lea.hbm %s847_s9, 128 }
 0x374   :  { %p610_p5 = scmp.ne.s32.totalorder %s847_s9, %s609_s3  ;;  %p613_p6 = scmp.lt.u32.totalorder %s609_s3, %s847_s9 }
 0x376   :  { %p615_p7 = pnand %p613_p6, %p610_p5 }
 0x378   :  { %618 = shalt.err (!%p615_p7)
}
 0x379   :  { %403 = dma.vmem_to_hbm [thread:$0]  %s401_s20, 128, %s847_s9, [#allocation3]  }
 0x37a   :  { %619 = dma.done.wait [#allocation3], 128  }
 0x37b   :  { %620 = vsyncadd [#allocation3], 4294967168 }
 0x37c   :  { %407 = vsyncpa [#allocation3], 1 }

</bundles_post_ra>
